<compile_context>
chip_gen: v6e
topology: v6e:2x2x1
jax: 0.10.0
libtpu: 0.0.40
codegen_flags: <defaults>
</compile_context>

<pallas_src>
import functools

import jax
import jax.numpy as jnp
from jax.experimental import pallas as pl
from jax.experimental.pallas import tpu as pltpu


def _gcl_kernel(rmap_ref, th_ref, m1_ref, m2_ref, out_ref, *, alpha, eps, limit_min):
    """One (b*H+h, col-block) tile: abs/limit -> label -> balanced CE (1 log) -> sum."""
    del rmap_ref                                  # only used by the mat2 index_map gather
    th = th_ref[pl.program_id(0)]                 # per-(b,h) threshold, SMEM scalar

    m1 = jnp.abs(m1_ref[...]).astype(jnp.float32)   # (1, 1, Sb, L)
    m2 = m2_ref[...].astype(jnp.float32)
    if limit_min:
        scale = 1.0 - 2.0 * eps
        m1 = scale * m1 + eps
        m2 = scale * m2 + eps

    # label = 1 where diff >= threshold (reference: label = 0 where diff < mins)
    pos = (m1 - m2) >= th
    # With label in {0,1} the two balanced-CE terms collapse to a single log:
    #   label=1: -alpha     * log(m1 * (1-m2))
    #   label=0: -(1-alpha) * log((1-m1) * m2)
    prod = jnp.where(pos, m1 * (1.0 - m2), (1.0 - m1) * m2)
    coef = jnp.where(pos, alpha, 1.0 - alpha)
    loss = -coef * jnp.log(prod)                  # 1 EUP op / element

    out_ref[...] = jnp.sum(loss, axis=(-2, -1), keepdims=True)


def graph_contrastive_loss(mat1, mat2, training, key=None, *,
                           cl_sparity_rate=0.3,
                           disturb_indices_bool=True,
                           indices_disturb_type="samble_only",
                           limite_min_value_bool=True,
                           eps=1e-5,
                           max_tile_bytes=1 << 20):
    B, H, N, M = mat1.shape
    NN = N * M
    BH = B * H
    alpha = 1.0 - cl_sparity_rate

    # --- disturb_indices: head permutation realised as an index_map gather (no mat2 copy).
    if disturb_indices_bool and training and indices_disturb_type == "samble_only":
        perm = jax.random.permutation(key, H)
    else:
        perm = jnp.arange(H)
    # TODO(synk): 'all' mode uses torch paired advanced indexing (requires B == H); not replicated.
    row_map = (jnp.arange(B, dtype=jnp.int32)[:, None] * H
               + perm[None, :].astype(jnp.int32)).reshape(BH)

    # --- per-(b,h) quantile threshold (sort-based; no clean Pallas path) in one fused pass.
    scale = (1.0 - 2.0 * eps) if limite_min_value_bool else 1.0
    off = eps if limite_min_value_bool else 0.0
    m1_rows = mat1.reshape(BH, NN).astype(jnp.float32)
    m2_rows = mat2.reshape(BH, NN).astype(jnp.float32)[row_map]   # paired rows, quantile only
    diff = (scale * jnp.abs(m1_rows) + off) - (scale * m2_rows + off)
    # TODO(synk): a top_k-based threshold would avoid the full per-row sort for large N*N.
    thresh = jnp.quantile(diff, 1.0 - cl_sparity_rate, axis=-1).astype(jnp.float32)  # (BH,)

    # --- lane-dense view of each (b,h) slab: (S rows x L lanes), L a multiple of 128 if possible.
    if NN % 128 == 0:
        L = 128
        S = NN // 128
    else:
        L = NN
        S = 1
    itemsize = mat1.dtype.itemsize
    max_rows = max(1, max_tile_bytes // (L * itemsize))
    if S <= max_rows:
        Sb = S                                     # whole slab in one tile
    else:
        Sb = S                                     # fallback: single full block (rare)
        for cand in range(8, int(max_rows) + 1, 8):
            if S % cand == 0:
                Sb = cand                          # largest multiple-of-8 divisor that fits
    C = S // Sb
    m1_view = mat1.reshape(BH, 1, S, L)
    m2_view = mat2.reshape(BH, 1, S, L)

    kernel = functools.partial(_gcl_kernel, alpha=alpha, eps=eps,
                               limit_min=limite_min_value_bool)
    total = B * H * N * M
    cost = pl.CostEstimate(
        flops=13 * total,
        transcendentals=1 * total,
        bytes_accessed=2 * total * itemsize + BH * C * 4 + BH * 8,
    )
    partial_sums = pl.pallas_call(
        kernel,
        out_shape=jax.ShapeDtypeStruct((BH, C, 1, 1), jnp.float32),
        grid_spec=pltpu.PrefetchScalarGridSpec(
            num_scalar_prefetch=2,                       # row_map (int32), thresh (f32) -> SMEM
            grid=(BH, C),
            in_specs=[
                pl.BlockSpec((1, 1, Sb, L), lambda r, c, rmap, th: (r, 0, c, 0)),
                pl.BlockSpec((1, 1, Sb, L), lambda r, c, rmap, th: (rmap[r], 0, c, 0)),
            ],
            out_specs=pl.BlockSpec((1, 1, 1, 1), lambda r, c, rmap, th: (r, c, 0, 0)),
        ),
        compiler_params=pltpu.CompilerParams(
            dimension_semantics=("parallel", "parallel")),
        cost_estimate=cost,
    )(row_map, thresh, m1_view, m2_view)

    # NOTE: the PyTorch module's NaN debug print is intentionally omitted (side effect only).
    loss_mean = jnp.sum(partial_sums) / float(total)
    return loss_mean.reshape(1)


def _reference(mat1, mat2, training, key, *, cl_sparity_rate, eps):
    """Pure-JAX replica of the PyTorch forward (for correctness check)."""
    mat1 = jnp.abs(mat1).astype(jnp.float32)
    mat2 = mat2.astype(jnp.float32)
    B, H, N, M = mat1.shape
    alpha = 1.0 - cl_sparity_rate
    if training:
        perm = jax.random.permutation(key, H)
        mat2 = mat2[:, perm, :, :]
    m1 = (1.0 - 2.0 * eps) * mat1 + eps
    m2 = (1.0 - 2.0 * eps) * mat2 + eps
    diff = m1 - m2
    mins = jnp.quantile(diff.reshape(B, H, -1), 1.0 - cl_sparity_rate,
                        axis=-1)[:, :, None, None]
    label = jnp.where(diff < mins, 0.0, 1.0)
    loss1 = -alpha * label * jnp.log(m1) - (1 - alpha) * (1 - label) * jnp.log(1 - m1)
    loss2 = -(1 - alpha) * (1 - label) * jnp.log(m2) - alpha * label * jnp.log(1 - m2)
    return jnp.mean(loss1 + loss2).reshape(1)


if __name__ == "__main__":
    B, H, N = 2, 4, 16
    cl_sparity_rate = 0.3
    eps = 1e-5

    key = jax.random.PRNGKey(0)
    k1, k2, k3 = jax.random.split(key, 3)
    # inputs in (0, 1) so log() / log(1 - .) stay finite, matching the intended use
    mat1 = jax.random.uniform(k1, (B, H, N, N), dtype=jnp.float32)
    mat2 = jax.random.uniform(k2, (B, H, N, N), dtype=jnp.float32)

    out = graph_contrastive_loss(mat1, mat2, training=True, key=k3,
                                 cl_sparity_rate=cl_sparity_rate, eps=eps)
    out = jax.block_until_ready(out)

    ref = _reference(mat1, mat2, True, k3, cl_sparity_rate=cl_sparity_rate, eps=eps)
    assert out.shape == (1,)
    assert jnp.allclose(out, ref, rtol=1e-5, atol=1e-6), (out, ref)
    print("KERNEL_OK")
</pallas_src>

<mosaic_0001>
module attributes {stable_mosaic.version = 11 : i64} {
  func.func @_gcl_kernel(%arg0: i32, %arg1: i32, %arg2: memref<8xi32, #tpu.memory_space<smem>>, %arg3: memref<8xf32, #tpu.memory_space<smem>>, %arg4: memref<1x1x2x128xf32, #tpu.memory_space<vmem>>, %arg5: memref<1x1x2x128xf32, #tpu.memory_space<vmem>>, %arg6: memref<1x1x1x1xf32, #tpu.memory_space<vmem>>) attributes {dimension_semantics = [#tpu.dimension_semantics<parallel>, #tpu.dimension_semantics<parallel>], iteration_bounds = array<i64: 8, 1>, scalar_prefetch = 2 : i64, scratch_operands = 0 : i64, tpu.core_type = #tpu.core_type<tc>, window_params = [{transform_indices = @transform_0, window_bounds = array<i64: 1, 1, 2, 128>}, {transform_indices = @transform_1, window_bounds = array<i64: 1, 1, 2, 128>}, {transform_indices = @transform_2, window_bounds = array<i64: 1, 1, 1, 1>}]} {
    %0 = arith.index_cast %arg0 : i32 to index
    %1 = memref.load %arg3[%0] : memref<8xf32, #tpu.memory_space<smem>>
    %c0 = arith.constant 0 : index
    %c0_0 = arith.constant 0 : index
    %c0_1 = arith.constant 0 : index
    %c0_2 = arith.constant 0 : index
    %2 = vector.load %arg4[%c0, %c0_0, %c0_1, %c0_2] : memref<1x1x2x128xf32, #tpu.memory_space<vmem>>, vector<1x1x2x128xf32>
    %3 = math.absf %2 : vector<1x1x2x128xf32>
    %c0_3 = arith.constant 0 : index
    %c0_4 = arith.constant 0 : index
    %c0_5 = arith.constant 0 : index
    %c0_6 = arith.constant 0 : index
    %4 = vector.load %arg5[%c0_3, %c0_4, %c0_5, %c0_6] : memref<1x1x2x128xf32, #tpu.memory_space<vmem>>, vector<1x1x2x128xf32>
    %cst = arith.constant 0.999979972 : f32
    %5 = vector.broadcast %cst : f32 to vector<1x1x2x128xf32>
    %6 = arith.mulf %5, %3 : vector<1x1x2x128xf32>
    %cst_7 = arith.constant 9.99999974E-6 : f32
    %7 = vector.broadcast %cst_7 : f32 to vector<1x1x2x128xf32>
    %8 = arith.addf %6, %7 : vector<1x1x2x128xf32>
    %cst_8 = arith.constant 0.999979972 : f32
    %9 = vector.broadcast %cst_8 : f32 to vector<1x1x2x128xf32>
    %10 = arith.mulf %9, %4 : vector<1x1x2x128xf32>
    %cst_9 = arith.constant 9.99999974E-6 : f32
    %11 = vector.broadcast %cst_9 : f32 to vector<1x1x2x128xf32>
    %12 = arith.addf %10, %11 : vector<1x1x2x128xf32>
    %13 = arith.subf %8, %12 : vector<1x1x2x128xf32>
    %14 = vector.broadcast %1 : f32 to vector<1x1x2x128xf32>
    %15 = arith.cmpf oge, %13, %14 : vector<1x1x2x128xf32>
    %cst_10 = arith.constant 1.000000e+00 : f32
    %16 = vector.broadcast %cst_10 : f32 to vector<1x1x2x128xf32>
    %17 = arith.subf %16, %12 : vector<1x1x2x128xf32>
    %18 = arith.mulf %8, %17 : vector<1x1x2x128xf32>
    %cst_11 = arith.constant 1.000000e+00 : f32
    %19 = vector.broadcast %cst_11 : f32 to vector<1x1x2x128xf32>
    %20 = arith.subf %19, %8 : vector<1x1x2x128xf32>
    %21 = arith.mulf %20, %12 : vector<1x1x2x128xf32>
    %22 = arith.select %15, %18, %21 : vector<1x1x2x128xi1>, vector<1x1x2x128xf32>
    %cst_12 = arith.constant 0.699999988 : f32
    %cst_13 = arith.constant 3.000000e-01 : f32
    %23 = vector.broadcast %cst_12 : f32 to vector<1x1x2x128xf32>
    %24 = vector.broadcast %cst_13 : f32 to vector<1x1x2x128xf32>
    %25 = arith.select %15, %23, %24 : vector<1x1x2x128xi1>, vector<1x1x2x128xf32>
    %cst_14 = arith.constant 0.000000e+00 : f32
    %26 = vector.broadcast %cst_14 : f32 to vector<1x1x2x128xf32>
    %27 = arith.subf %26, %25 : vector<1x1x2x128xf32>
    %28 = math.log %22 : vector<1x1x2x128xf32>
    %29 = arith.mulf %27, %28 : vector<1x1x2x128xf32>
    %cst_15 = arith.constant dense<0.000000e+00> : vector<1x1xf32>
    %30 = vector.multi_reduction <add>, %29, %cst_15 [2, 3] : vector<1x1x2x128xf32> to vector<1x1xf32>
    %31 = vector.shape_cast %30 : vector<1x1xf32> to vector<1x1x1x1xf32>
    %c0_16 = arith.constant 0 : index
    %c0_17 = arith.constant 0 : index
    %c0_18 = arith.constant 0 : index
    %c0_19 = arith.constant 0 : index
    %32 = vector.load %arg6[%c0_16, %c0_17, %c0_18, %c0_19] : memref<1x1x1x1xf32, #tpu.memory_space<vmem>>, vector<1x1x1x1xf32>
    tpu.vector_store %arg6[%c0_16, %c0_17, %c0_18, %c0_19], %31 {strides = array<i32>} : memref<1x1x1x1xf32, #tpu.memory_space<vmem>>, vector<1x1x1x1xf32>,
    return
  }
  func.func @transform_0(%arg0: i32, %arg1: i32, %arg2: memref<8xi32, #tpu.memory_space<smem>>, %arg3: memref<8xf32, #tpu.memory_space<smem>>) -> (i32, i32, i32, i32) {
    %c0_i32 = arith.constant 0 : i32
    %c0_i32_0 = arith.constant 0 : i32
    %c0_i32_1 = arith.constant 0 : i32
    return %arg0, %c0_i32, %arg1, %c0_i32_0 : i32, i32, i32, i32
  }
  func.func @transform_1(%arg0: i32, %arg1: i32, %arg2: memref<8xi32, #tpu.memory_space<smem>>, %arg3: memref<8xf32, #tpu.memory_space<smem>>) -> (i32, i32, i32, i32) {
    %0 = arith.index_cast %arg0 : i32 to index
    %1 = memref.load %arg2[%0] : memref<8xi32, #tpu.memory_space<smem>>
    %c0_i32 = arith.constant 0 : i32
    %c0_i32_0 = arith.constant 0 : i32
    %c0_i32_1 = arith.constant 0 : i32
    return %1, %c0_i32, %arg1, %c0_i32_0 : i32, i32, i32, i32
  }
  func.func @transform_2(%arg0: i32, %arg1: i32, %arg2: memref<8xi32, #tpu.memory_space<smem>>, %arg3: memref<8xf32, #tpu.memory_space<smem>>) -> (i32, i32, i32, i32) {
    %c0_i32 = arith.constant 0 : i32
    %c0_i32_0 = arith.constant 0 : i32
    %c0_i32_1 = arith.constant 0 : i32
    return %arg0, %arg1, %c0_i32, %c0_i32_0 : i32, i32, i32, i32
  }
}

</mosaic_0001>

<bundles_post_ra>
// kernel: tpu_custom_call.1
= control target key start
LH: loop header
LB: loop body
LE: loop exit
PB: predicated region body
PF: predicated region fallthrough
CT: control target
= control target key end

     0   :  { %s633_s15 = smov [#allocation3]   ;;  %s870_s0 = inlined_call_operand.hbm [shape: s32[8], index: 0, kind: input, shape index: {}]   ;;  %s871_s2 = inlined_call_operand.hbm [shape: f32[8,1,2,128], index: 2, kind: input, shape index: {}]   ;;  %s872_s3 = inlined_call_operand.hbm [shape: f32[8,1,2,128], index: 3, kind: input, shape index: {}]   ;;  %s873_s4 = inlined_call_operand.vmem [shape: f32[8,1,1,1], index: 4, kind: output, shape index: {}]   ;;  %s874_s1 = inlined_call_operand.vmem [shape: f32[8], index: 1, kind: input, shape index: {}]  }
   0x1   :  { %878 = sst [smem:[#allocation14_spill]] %s871_s2  ;;  %s11_s20 = sshll.u32 %s874_s1, 4  ;;  %s12_s20 = int_to_ptr.vmem [resolvable:$true] %s11_s20 }
   0x2   :  { %10 = dma.hbm_to_smem %s870_s0, 16, %s633_s15, [#allocation2] }
   0x3   :  { %s483_s21 = scalar_lea.vmem %s12_s20, 16  ;;  %p488_p1 = scmp.lt.s32.totalorder %s12_s20, %s12_s20 }
   0x4   :  { %p484_p0 = scmp.ne.s32.totalorder %s12_s20, %s483_s21  ;;  %p489_p2 = scmp.lt.s32.totalorder %s483_s21, %s483_s21 }
   0x6   :  { %p490_p3 = por %p489_p2, %p488_p1 }
   0x8   :  { %p491_p4 = pnand %p490_p3, %p484_p0 }
   0xa   :  { %494 = shalt.err (!%p491_p4)  }
   0xb   :  { %s634_s22 = smov [#allocation4]  }
   0xc   :  { %14 = dma.vmem_to_smem %s12_s20, 16, %s634_s22, [#allocation2] }
   0xd   :  { %587 = dma.done.wait [#allocation2], 32 }
   0xe   :  { %588 = vsyncadd [#allocation2], 4294967264 }
   0xf   :  { %16 = sfence }
  0x10   :  { %17 = vsyncpa [#allocation6], 0 }
  0x11   :  { %19 = vsyncpa [#allocation6 + $0x1], 0 }
  0x12   :  { %20 = vsyncpa [#allocation8], 0 }
  0x13   :  { %22 = vsyncpa [#allocation8 + $0x1], 0  ;;  %s669_s0 = smov 0   ;;  %s671_s1 = smov 0  }
  0x14   :  { %s673_s23 = smov 0   ;;  %s675_s24 = smov 0  }
  0x15   :  { %s677_s25 = smov 0   ;;  %s679_s26 = smov 0  }
  0x16   :  { %s681_s27 = smov 0   ;;  %s683_s28 = smov 0  }
  0x17   :  { %s685_s29 = smov 0  }
  0x18 LB: > { %s369_s30 = sadd.s32 4294967295, %s631_s29   ;;  %s40_s5 = sadd.s32 1, %s627_s28  ;;  %s631_s29 = sphi %s685_s29, %s28_s29   ;;  %s627_s28 = sphi %s683_s28, %s900_s28   ;;  %s623_s27 = sphi %s681_s27, %s899_s27   ;;  %s619_s26 = sphi %s679_s26, %s898_s26   ;;  %s615_s25 = sphi %s677_s25, %s897_s25   ;;  %s611_s24 = sphi %s675_s24, %s896_s24   ;;  %s607_s23 = sphi %s673_s23, %s895_s23   ;;  %s603_s1 = sphi %s671_s1, %s894_s1   ;;  %s599_s0 = sphi %s669_s0, %s893_s0  }
  0x19   : > { %p42_p5 = scmp.ge.s32.totalorder %s40_s5, 8  ;;  %s49_s6 = sadd.s32 1, %s619_s26 }
  0x1a   : > { %p56_p6 = scmp.ne.s32.totalorder %s619_s26, %s615_s25  ;;  %p57_p7 = scmp.eq.s32.totalorder %s631_s29, 0 }
  0x1b   : > { %s902_s5 = smov (%p42_p5, %s40_s5), 0  ;;  %p62_p9 = scmp.ne.s32.totalorder %s615_s25, %s611_s24 }
  0x1c   : > { %p722_p8 = por %p57_p7, %p56_p6  ;;  %s44_s8 = ssub.s32 %s627_s28, %s902_s5 }
  0x1d   : > { %p729_p10 = scmp.eq.s32.totalorder %s369_s30, 0  ;;  %p47_p11 = scmp.eq.s32.totalorder %s44_s8, 0 }
  0x1e   : > { %s734_s10 = sld [smem:[#allocation3 + %s627_s28]]  ;;  %p875_p13 = scmp.lt.s32.totalorder %s631_s29, 8 }
  0x1f   : > { %p738_p12 = por %p729_p10, %p62_p9  ;;  %s743_s12 = sld [smem:[#allocation3 + %s902_s5]] }
  0x20   : > { %s746_s13 = scalar_select %p47_p11, %s619_s26, %s49_s6  }
  0x21   : > { %s881_s11 = scalar_select %p738_p12, 1, 0 }
  0x22   : > { %s144_s14 = sand.u32 1, %s619_s26   ;;  %s374_s15 = sshll.u32 %s627_s28, 5 }
  0x23   : > { %s373_s16 = sshll.u32 %s144_s14, 1  ;;  %s882_s2 = sld [smem:[#allocation14_spill]] }
  0x24   : > { %s148_s20 = scalar_lea.vmem [#allocation5], %s373_s16  ;;  %p758_p0 = pnand %p875_p13, %p722_p8 }
  0x25   : > { %s156_s21 = sshll.u32 %s148_s20, 4  ;;  %p377_p1 = scmp.ge.s32.totalorder %s631_s29, 1  ;;  %s157_s21 = int_to_ptr.vmem [resolvable:$true] %s156_s21 }
  0x26   : > { %p181_p2 = scmp.lt.s32.totalorder %s631_s29, 9  ;;  %s145_s24 = scalar_lea.sflag [#allocation6], %s144_s14 }
  0x27   : > { %p497_p3 = pneg %p758_p0  ;;  %s508_s30 = scalar_lea.vmem %s157_s21, 32 }
  0x28   : > { %p509_p4 = scmp.ne.s32.totalorder %s157_s21, %s508_s30  ;;  %s635_s6 = smov [#allocation5]  }
  0x29   : > { %s154_s19 = scalar_lea.hbm %s882_s2, %s374_s15  ;;  %s513_s8 = sshll.u32 %s635_s6, 4  ;;  %s514_s8 = int_to_ptr.vmem [resolvable:$false] %s513_s8 }
  0x2a   : > { %p511_p5 = pnand %p509_p4, %p497_p3  ;;  %s515_s7 = scalar_lea.vmem %s514_s8, 64 }
  0x2b   : > { %p516_p9 = scmp.lt.s32.totalorder %s157_s21, %s514_s8  ;;  %p517_p8 = scmp.lt.s32.totalorder %s515_s7, %s508_s30 }
  0x2c   : > { %p512_p6 = pneg %p511_p5 }
  0x2d   : > { %p518_p11 = por %p517_p8, %p516_p9 }
  0x2f   : > { %p519_p13 = pnand %p518_p11, %p512_p6 }
  0x31   : > { %522 = shalt.err (!%p519_p13)
}
  0x32   : > { %391 = dma.hbm_to_vmem [thread:$0]  (!%p758_p0), %s154_s19, 32, %s157_s21, %s145_s24  }
  0x33   : > { %p772_p13 = pnand %p377_p1, %p181_p2  ;;  %s74_s15 = ssub.s32 %s734_s10, %s743_s12 }
  0x34   : > { %p77_p3 = scmp.eq.s32.totalorder %s74_s15, 0  ;;  %s79_s16 = sadd.s32 1, %s607_s23 }
  0x35   : > { %s884_s14 = scalar_select %p772_p13, 1, 0 }
  0x36   : > { %p86_p4 = scmp.ne.s32.totalorder %s607_s23, %s603_s1  ;;  %p92_p5 = scmp.ne.s32.totalorder %s603_s1, %s599_s0 }
  0x37   : > { %s784_s17 = scalar_select %p77_p3, %s607_s23, %s79_s16  }
  0x38   : > { %p88_p6 = por %p86_p4, %p57_p7  ;;  %p790_p9 = por %p92_p5, %p729_p10 }
  0x39   : > { %s163_s19 = sand.u32 1, %s607_s23   ;;  %p886_p0 = scmp.lt.s32.totalorder %s631_s29, 8 }
  0x3a   : > { %s885_s18 = scalar_select %p790_p9, 1, 0 }
  0x3b   : > { %s375_s20 = sshll.u32 %s163_s19, 1  ;;  %p797_p1 = pnand %p886_p0, %p88_p6 }
  0x3c   : > { %s383_s10 = scalar_select %p88_p6, [#allocation3], [#allocation9] }
  0x3d   : > { %s384_s12 = scalar_select %p88_p6, %s627_s28, 0 }
  0x3e   : > { %p888_p2 = pmov %p886_p0  ;;  %p889_p8 = pmov %p886_p0 }
  0x3f   : > { %s167_s9 = scalar_lea.vmem [#allocation7], %s375_s20  ;;  %s164_s7 = scalar_lea.sflag [#allocation8], %s163_s19 }
  0x40   : > { %s904_s10 = smov (!%p888_p2, %s383_s10), [#allocation10]  ;;  %s906_s12 = smov (!%p889_p8, %s384_s12), 0 }
  0x41   : > { %s168_s0 = sld [smem:[%s904_s10 + %s906_s12]]  ;;  %s176_s22 = sshll.u32 %s167_s9, 4  ;;  %s806_s22 = int_to_ptr.vmem [resolvable:$true] %s176_s22 }
  0x42   : > { %p525_p10 = pneg %p797_p1  ;;  %s528_s10 = scalar_lea.hbm %s872_s3, 256 }
  0x47   : > { %s376_s24 = sshll.u32 %s168_s0, 5 }
  0x48   : > { %s174_s8 = scalar_lea.hbm %s872_s3, %s376_s24 }
  0x49   : > { %s523_s15 = scalar_lea.hbm %s174_s8, 32  ;;  %p529_p4 = scmp.lt.s32.totalorder %s174_s8, %s872_s3 }
  0x4a   : > { %p524_p7 = scmp.ne.s32.totalorder %s174_s8, %s523_s15  ;;  %p530_p5 = scmp.lt.s32.totalorder %s528_s10, %s523_s15 }
  0x4c   : > { %p526_p11 = pnand %p525_p10, %p524_p7  ;;  %p531_p6 = por %p530_p5, %p529_p4 }
  0x4e   : > { %p527_p3 = pneg %p526_p11 }
  0x50   : > { %p532_p0 = pnand %p531_p6, %p527_p3 }
  0x52   : > { %535 = shalt.err (!%p532_p0)
}
  0x53   : > { %s536_s19 = scalar_lea.vmem %s806_s22, 32  ;;  %s636_s0 = smov [#allocation7]  }
  0x54   : > { %p537_p2 = scmp.ne.s32.totalorder %s806_s22, %s536_s19  ;;  %s541_s9 = sshll.u32 %s636_s0, 4  ;;  %s542_s9 = int_to_ptr.vmem [resolvable:$false] %s541_s9 }
  0x55   : > { %s543_s2 = scalar_lea.vmem %s542_s9, 64  ;;  %p544_p11 = scmp.lt.s32.totalorder %s806_s22, %s542_s9 }
  0x56   : > { %p539_p8 = pnand %p537_p2, %p525_p10  ;;  %p545_p9 = scmp.lt.s32.totalorder %s543_s2, %s536_s19 }
  0x58   : > { %p540_p7 = pneg %p539_p8  ;;  %p546_p12 = por %p545_p9, %p544_p11 }
  0x5a   : > { %p547_p13 = pnand %p546_p12, %p540_p7 }
  0x5c   : > { %550 = shalt.err (!%p547_p13)
}
  0x5d   : > { %396 = dma.hbm_to_vmem [thread:$0]  (!%p797_p1), %s174_s8, 32, %s806_s22, %s164_s7  }
  0x5e   : > { %p890_p3 = scmp.ne.s32.totalorder %s884_s14, 0 }
  0x5f   : > { %s187_s24 = sand.u32 (!%p890_p3), 1, %s615_s25   ;;  %p891_p10 = scmp.ne.s32.totalorder (!%p890_p3), %s881_s11, 0 }
  0x60   : > { %185 = sbr.rel (%p890_p3) target bundleno = 288 (0x120), region = 28  ;;  %s378_s30 = sshll.u32 (!%p890_p3), %s187_s24, 1 }
  0x61   : > { %s188_s6 = scalar_lea.sflag (!%p890_p3), [#allocation6], %s187_s24  ;;  %s191_s15 = scalar_lea.vmem (!%p890_p3), [#allocation5], %s378_s30 }
  0x65   : > { %590 = dma.done.wait (%p891_p10), %s188_s6, 32  }
  0x66   : > { %592 = vsyncadd (%p891_p10), %s188_s6, 4294967264  ;;  %s196_s16 = sand.u32 1, %s603_s1   ;;  %p892_p12 = scmp.ne.s32.totalorder %s885_s18, 0 }
  0x67   : > { %s379_s21 = sshll.u32 %s196_s16, 1  ;;  %s197_s10 = scalar_lea.sflag [#allocation8], %s196_s16 }
  0x68   : > { %s200_s22 = scalar_lea.vmem [#allocation7], %s379_s21 }
  0x69   : > { %594 = dma.done.wait (%p892_p12), %s197_s10, 32  }
  0x6a   : > { %596 = vsyncadd (%p892_p12), %s197_s10, 4294967264  ;;  %s234_s14 = sld [smem:[#allocation4 + %s623_s27]]  ;;  %v235_v0 = vld [vmem:[%s191_s15] sm:$0x3]  ;;  %v237_v1 = vld [vmem:[%s200_s22] sm:$0x3] }
  0x6b   : > { %v236_v2 = vand.u32 2147483647, %v235_v0  ;;  %v240_v3 = vmul.f32 0.99998, %v237_v1  ;;  %v637_v14 = vmov 0.3  }
  0x6c   : > { %vm255_vm1 = vcmask 1041408   ;;  %p228_p13 = scmp.lt.s32.totalorder %s623_s27, 7  ;;  %vm265_vm2 = vcmask 0  }
  0x6d   : > { %v238_v4 = vmul.f32 0.99998, %v236_v2  ;;  %v241_v5 = vadd.f32 1e-05, %v240_v3 }
  0x6e   : > { %s908_s27 = smov (!%p228_p13, %s623_s27), 7 }
  0x6f   : > { %v239_v6 = vadd.f32 1e-05, %v238_v4  ;;  %v245_v7 = vsub.f32 1.0, %v241_v5  ;;  %s233_s8 = scalar_lea.vmem %s873_s4, %s908_s27 }
  0x70   : > { %v243_v8 = vstv %s234_s14 }
  0x71   : > { %v242_v9 = vsub.f32 %v239_v6, %v241_v5  ;;  %v246_v10 = vmul.f32 %v245_v7, %v239_v6  ;;  %v247_v11 = vsub.f32 1.0, %v239_v6 }
  0x73   : > { %vm244_vm0 = vcmp.ge.f32.partialorder %v242_v9, %v243_v8  ;;  %v248_v12 = vmul.f32 %v247_v11, %v241_v5 }
  0x74   : > { %v250_v15 = vsel %vm244_vm0, 0.7, %v637_v14 }
  0x75   : > { %v249_v13 = vsel %vm244_vm0, %v246_v10, %v248_v12  ;;  %v251_v16 = vsub.f32 0.0, %v250_v15 }
  0x76   : > { %473 = vlog2.f32 %v249_v13 }
  0x83   : > { %v474_v17 = vpop.eup %473 }
  0x84   : > { %v253_v18 = vmul.f32 0.6931472, %v474_v17 }
  0x86   : > { %v254_v19 = vmul.f32 %v253_v18, %v251_v16 }
  0x88   : > { %v256_v20 = vsel %vm255_vm1, %v254_v19, 0.0 }
  0x89   : > { %257 = vadd.xlane.f32.xlu0 %v256_v20 }
 0x112   : > { %v258_v21 = vpop.xlane.xlu0 %257 }
 0x113   : > { %v259_v22 = vrot.slane %v258_v21, 4 }
 0x115   : > { %v260_v23 = vadd.f32 %v259_v22, %v258_v21 }
 0x117   : > { %v261_v24 = vrot.slane %v260_v23, 2 }
 0x119   : > { %v262_v25 = vadd.f32 %v261_v24, %v260_v23 }
 0x11b   : > { %v263_v26 = vrot.slane %v262_v25, 1 }
 0x11d   : > { %v264_v27 = vadd.f32 %v263_v26, %v262_v25 }
 0x11f   : > { %266 = vst.msk [vmem:[%s233_s8] sm:$0x1] %vm265_vm2, %v264_v27 }
 0x120 PF: > { %s28_s29 = sadd.s32 1, %s631_s29   ;;  %s893_s0 = smov %s603_s1 }
 0x121   : > { %p25_p9 = scmp.ge.s32.totalorder %s28_s29, 10   ;;  %s894_s1 = smov %s607_s23 }
 0x122   : > { %s895_s23 = smov %s784_s17  ;;  %s896_s24 = smov %s615_s25 }
 0x123   : > { %s897_s25 = smov %s619_s26  ;;  %s898_s26 = smov %s746_s13 }
 0x124   : > { %s899_s27 = smov %s627_s28  ;;  %s900_s28 = smov %s902_s5 }
 0x125   :  { %27 = sbr.rel (!%p25_p9) target bundleno = 24 (0x18), region = 81 }
 0x12a   :  { %290 = vsyncpa [#allocation6], 1 }
 0x12b   :  { %292 = vsyncpa [#allocation6 + $0x1], 1 }
 0x12c   :  { %293 = vsyncpa [#allocation8], 1 }
 0x12d   :  { %295 = vsyncpa [#allocation8 + $0x1], 1 }

</bundles_post_ra>
